<compile_context>
chip_gen: v5e
topology: v5e:2x2
jax: 0.10.0
libtpu: 0.0.40
codegen_flags: <defaults>
</compile_context>

<pallas_src>
import jax
import jax.numpy as jnp
from jax.experimental import pallas as pl
from jax.experimental.pallas import tpu as pltpu


def _round_up(n, m):
    return ((n + m - 1) // m) * m


def _srl_head_kernel(x_ref, w0_ref, b0_ref, w1_ref, b1_ref, w2_ref, b2_ref,
                     o_ref):
    # Fused: (x @ W0 + b0) -> tanh -> (@ W1 + b1) -> tanh -> (@ W2 + b2).
    # Matmuls run in the weights' dtype (bf16 recommended) with f32
    # accumulation; bias add + tanh epilogues stay in f32.
    cdt = w0_ref.dtype

    x = x_ref[...]
    h0 = jnp.dot(x, w0_ref[...], preferred_element_type=jnp.float32)
    h0 = jnp.tanh(h0 + b0_ref[...])                      # b0: (1, H) broadcast

    h1 = jnp.dot(h0.astype(cdt), w1_ref[...],
                 preferred_element_type=jnp.float32)
    h1 = jnp.tanh(h1 + b1_ref[...])                      # b1: (1, H) broadcast

    out = jnp.dot(h1.astype(cdt), w2_ref[...],
                  preferred_element_type=jnp.float32)
    out = out + b2_ref[...]                              # b2: (1, Npad) broadcast

    o_ref[...] = out.astype(o_ref.dtype)


def unmasked_srl_head(x, params, *, block_rows=512, compute_dtype=jnp.bfloat16):
    """x: (..., hidden). Returns (..., 3) in x.dtype.

    compute_dtype: dtype used for the MXU matmul operands (accumulation is
    always f32). Use jnp.float32 for bit-exact parity with the reference.
    """
    w0, b0, w1, b1, w2, b2 = params
    hidden = x.shape[-1]
    n_out = w2.shape[-1]
    out_dtype = x.dtype
    lead_shape = x.shape[:-1]

    # --- Lane-pad the final projection so the output store is lane-dense. ---
    n_out_pad = max(_round_up(n_out, 128), 128)
    w2p = jnp.zeros((hidden, n_out_pad), w2.dtype).at[:, :n_out].set(w2)
    b2p = jnp.zeros((1, n_out_pad), b2.dtype).at[:, :n_out].set(b2)

    # --- Row tiling: large sublane-aligned blocks, zero-pad the remainder. ---
    x2d = x.reshape(-1, hidden)
    n_rows = x2d.shape[0]
    eff_block = min(block_rows, _round_up(n_rows, 8))    # multiple of 8
    padded_rows = _round_up(n_rows, eff_block)
    if padded_rows != n_rows:
        x2d = jnp.pad(x2d, ((0, padded_rows - n_rows), (0, 0)))

    # --- dtypes: matmul operands in compute_dtype, biases in f32. ---
    x2d = x2d.astype(compute_dtype)
    w0c = w0.astype(compute_dtype)
    w1c = w1.astype(compute_dtype)
    w2c = w2p.astype(compute_dtype)
    b0f = b0.astype(jnp.float32)
    b1f = b1.astype(jnp.float32)
    b2f = b2p.astype(jnp.float32)

    grid = (padded_rows // eff_block,)
    rep = lambda i: (0, 0)   # weights/biases: same full block every step

    def _in_specs(weight_mode):
        kw = {} if weight_mode is None else {"pipeline_mode": weight_mode}
        return [
            pl.BlockSpec((eff_block, hidden), lambda i: (i, 0)),   # x tile
            pl.BlockSpec((hidden, hidden), rep, **kw),             # W0
            pl.BlockSpec((1, hidden), rep, **kw),                  # b0
            pl.BlockSpec((hidden, hidden), rep, **kw),             # W1
            pl.BlockSpec((1, hidden), rep, **kw),                  # b1
            pl.BlockSpec((hidden, n_out_pad), rep, **kw),          # W2 (padded)
            pl.BlockSpec((1, n_out_pad), rep, **kw),               # b2 (padded)
        ]

    def _call(weight_mode):
        return pl.pallas_call(
            _srl_head_kernel,
            out_shape=jax.ShapeDtypeStruct((padded_rows, n_out_pad), out_dtype),
            grid_spec=pl.GridSpec(
                grid=grid,
                in_specs=_in_specs(weight_mode),
                out_specs=pl.BlockSpec((eff_block, n_out_pad),
                                       lambda i: (i, 0)),
            ),
            compiler_params=pltpu.CompilerParams(
                dimension_semantics=("parallel",),
                vmem_limit_bytes=64 * 1024 * 1024,
            ),
        )(x2d, w0c, b0f, w1c, b1f, w2c, b2f)

    try:
        # Weights/biases are grid-invariant: single-buffer them to save VMEM.
        out = _call(pl.Buffered(1))
    except Exception:
        # Fallback: default (double) buffering if Buffered(1) is unsupported.
        out = _call(None)

    out = out[:n_rows, :n_out]
    return out.reshape(*lead_shape, n_out)


def init_params(key, hidden_size, n_out=3, dtype=jnp.float32):
    """Deterministic synthetic parameters (PyTorch Linear shapes, transposed)."""
    k0, k1, k2, k3, k4, k5 = jax.random.split(key, 6)
    scale = 1.0 / jnp.sqrt(hidden_size)
    w0 = jax.random.uniform(k0, (hidden_size, hidden_size), dtype, -scale, scale)
    b0 = jax.random.uniform(k1, (1, hidden_size), dtype, -scale, scale)
    w1 = jax.random.uniform(k2, (hidden_size, hidden_size), dtype, -scale, scale)
    b1 = jax.random.uniform(k3, (1, hidden_size), dtype, -scale, scale)
    w2 = jax.random.uniform(k4, (hidden_size, n_out), dtype, -scale, scale)
    b2 = jax.random.uniform(k5, (1, n_out), dtype, -scale, scale)
    return (w0, b0, w1, b1, w2, b2)


def _reference(x, params):
    """Plain-JAX f32 reference for correctness check."""
    w0, b0, w1, b1, w2, b2 = params
    h0 = jnp.tanh(x @ w0 + b0[0])
    h1 = jnp.tanh(h0 @ w1 + b1[0])
    return h1 @ w2 + b2[0]


if __name__ == "__main__":
    batch, seq, hidden = 2, 8, 32
    key = jax.random.PRNGKey(0)
    kx, kp = jax.random.split(key)

    x = jax.random.normal(kx, (batch, seq, hidden), dtype=jnp.float32)
    params = init_params(kp, hidden)

    ref = _reference(x, params)

    # f32 compute path: bit-accurate parity with the reference.
    out_f32 = jax.block_until_ready(
        unmasked_srl_head(x, params, compute_dtype=jnp.float32))
    assert out_f32.shape == (batch, seq, 3), out_f32.shape
    assert jnp.allclose(out_f32, ref, atol=1e-5, rtol=1e-5), "f32 mismatch"

    # Default bf16 MXU path: looser tolerance (operands quantized, acc is f32).
    out_bf16 = jax.block_until_ready(unmasked_srl_head(x, params))
    assert out_bf16.shape == (batch, seq, 3), out_bf16.shape
    assert jnp.allclose(out_bf16, ref, atol=5e-2, rtol=5e-2), "bf16 mismatch"

    print("KERNEL_OK")
</pallas_src>

<mosaic_0001>
module attributes {stable_mosaic.version = 11 : i64} {
  func.func @_srl_head_kernel(%arg0: i32, %arg1: memref<16x32xf32, #tpu.memory_space<vmem>>, %arg2: memref<32x32xf32, #tpu.memory_space<vmem>>, %arg3: memref<1x32xf32, #tpu.memory_space<vmem>>, %arg4: memref<32x32xf32, #tpu.memory_space<vmem>>, %arg5: memref<1x32xf32, #tpu.memory_space<vmem>>, %arg6: memref<32x128xf32, #tpu.memory_space<vmem>>, %arg7: memref<1x128xf32, #tpu.memory_space<vmem>>, %arg8: memref<16x128xf32, #tpu.memory_space<vmem>>) attributes {dimension_semantics = [#tpu.dimension_semantics<parallel>], iteration_bounds = array<i64: 1>, scalar_prefetch = 0 : i64, scratch_operands = 0 : i64, tpu.core_type = #tpu.core_type<tc>, window_params = [{transform_indices = @transform_0, window_bounds = array<i64: 16, 32>}, {pipeline_mode = #tpu.pipeline_mode<synchronous>, transform_indices = @transform_1, window_bounds = array<i64: 32, 32>}, {pipeline_mode = #tpu.pipeline_mode<synchronous>, transform_indices = @transform_2, window_bounds = array<i64: 1, 32>}, {pipeline_mode = #tpu.pipeline_mode<synchronous>, transform_indices = @transform_3, window_bounds = array<i64: 32, 32>}, {pipeline_mode = #tpu.pipeline_mode<synchronous>, transform_indices = @transform_4, window_bounds = array<i64: 1, 32>}, {pipeline_mode = #tpu.pipeline_mode<synchronous>, transform_indices = @transform_5, window_bounds = array<i64: 32, 128>}, {pipeline_mode = #tpu.pipeline_mode<synchronous>, transform_indices = @transform_6, window_bounds = array<i64: 1, 128>}, {transform_indices = @transform_7, window_bounds = array<i64: 16, 128>}]} {
    %c0 = arith.constant 0 : index
    %c0_0 = arith.constant 0 : index
    %0 = vector.load %arg1[%c0, %c0_0] : memref<16x32xf32, #tpu.memory_space<vmem>>, vector<16x32xf32>
    %c0_1 = arith.constant 0 : index
    %c0_2 = arith.constant 0 : index
    %1 = vector.load %arg2[%c0_1, %c0_2] : memref<32x32xf32, #tpu.memory_space<vmem>>, vector<32x32xf32>
    %cst = arith.constant dense<0.000000e+00> : vector<16x32xf32>
    %2 = tpu.matmul %0, %1, %cst {dimension_numbers = #tpu.dot_dimension_numbers<[1], [0], [0], [1], [0, 0, 1, 1], [], []>} : vector<16x32xf32>, vector<32x32xf32>, vector<16x32xf32> -> vector<16x32xf32>
    %c0_3 = arith.constant 0 : index
    %c0_4 = arith.constant 0 : index
    %3 = vector.load %arg3[%c0_3, %c0_4] : memref<1x32xf32, #tpu.memory_space<vmem>>, vector<1x32xf32>
    %4 = vector.broadcast %3 : vector<1x32xf32> to vector<16x32xf32>
    %5 = arith.addf %2, %4 : vector<16x32xf32>
    %6 = math.tanh %5 : vector<16x32xf32>
    %c0_5 = arith.constant 0 : index
    %c0_6 = arith.constant 0 : index
    %7 = vector.load %arg4[%c0_5, %c0_6] : memref<32x32xf32, #tpu.memory_space<vmem>>, vector<32x32xf32>
    %cst_7 = arith.constant dense<0.000000e+00> : vector<16x32xf32>
    %8 = tpu.matmul %6, %7, %cst_7 {dimension_numbers = #tpu.dot_dimension_numbers<[1], [0], [0], [1], [0, 0, 1, 1], [], []>} : vector<16x32xf32>, vector<32x32xf32>, vector<16x32xf32> -> vector<16x32xf32>
    %c0_8 = arith.constant 0 : index
    %c0_9 = arith.constant 0 : index
    %9 = vector.load %arg5[%c0_8, %c0_9] : memref<1x32xf32, #tpu.memory_space<vmem>>, vector<1x32xf32>
    %10 = vector.broadcast %9 : vector<1x32xf32> to vector<16x32xf32>
    %11 = arith.addf %8, %10 : vector<16x32xf32>
    %12 = math.tanh %11 : vector<16x32xf32>
    %c0_10 = arith.constant 0 : index
    %c0_11 = arith.constant 0 : index
    %13 = vector.load %arg6[%c0_10, %c0_11] : memref<32x128xf32, #tpu.memory_space<vmem>>, vector<32x128xf32>
    %cst_12 = arith.constant dense<0.000000e+00> : vector<16x128xf32>
    %14 = tpu.matmul %12, %13, %cst_12 {dimension_numbers = #tpu.dot_dimension_numbers<[1], [0], [0], [1], [0, 0, 1, 1], [], []>} : vector<16x32xf32>, vector<32x128xf32>, vector<16x128xf32> -> vector<16x128xf32>
    %c0_13 = arith.constant 0 : index
    %c0_14 = arith.constant 0 : index
    %15 = vector.load %arg7[%c0_13, %c0_14] : memref<1x128xf32, #tpu.memory_space<vmem>>, vector<1x128xf32>
    %16 = vector.broadcast %15 : vector<1x128xf32> to vector<16x128xf32>
    %17 = arith.addf %14, %16 : vector<16x128xf32>
    %c0_15 = arith.constant 0 : index
    %c0_16 = arith.constant 0 : index
    %18 = vector.load %arg8[%c0_15, %c0_16] : memref<16x128xf32, #tpu.memory_space<vmem>>, vector<16x128xf32>
    tpu.vector_store %arg8[%c0_15, %c0_16], %17 {strides = array<i32>} : memref<16x128xf32, #tpu.memory_space<vmem>>, vector<16x128xf32>,
    return
  }
  func.func @transform_0(%arg0: i32) -> (i32, i32) {
    %c0_i32 = arith.constant 0 : i32
    %c0_i32_0 = arith.constant 0 : i32
    return %arg0, %c0_i32 : i32, i32
  }
  func.func @transform_1(%arg0: i32) -> (i32, i32) {
    %c0_i32 = arith.constant 0 : i32
    %c0_i32_0 = arith.constant 0 : i32
    %c0_i32_1 = arith.constant 0 : i32
    return %c0_i32, %c0_i32_0 : i32, i32
  }
  func.func @transform_2(%arg0: i32) -> (i32, i32) {
    %c0_i32 = arith.constant 0 : i32
    %c0_i32_0 = arith.constant 0 : i32
    %c0_i32_1 = arith.constant 0 : i32
    return %c0_i32, %c0_i32_0 : i32, i32
  }
  func.func @transform_3(%arg0: i32) -> (i32, i32) {
    %c0_i32 = arith.constant 0 : i32
    %c0_i32_0 = arith.constant 0 : i32
    %c0_i32_1 = arith.constant 0 : i32
    return %c0_i32, %c0_i32_0 : i32, i32
  }
  func.func @transform_4(%arg0: i32) -> (i32, i32) {
    %c0_i32 = arith.constant 0 : i32
    %c0_i32_0 = arith.constant 0 : i32
    %c0_i32_1 = arith.constant 0 : i32
    return %c0_i32, %c0_i32_0 : i32, i32
  }
  func.func @transform_5(%arg0: i32) -> (i32, i32) {
    %c0_i32 = arith.constant 0 : i32
    %c0_i32_0 = arith.constant 0 : i32
    %c0_i32_1 = arith.constant 0 : i32
    return %c0_i32, %c0_i32_0 : i32, i32
  }
  func.func @transform_6(%arg0: i32) -> (i32, i32) {
    %c0_i32 = arith.constant 0 : i32
    %c0_i32_0 = arith.constant 0 : i32
    %c0_i32_1 = arith.constant 0 : i32
    return %c0_i32, %c0_i32_0 : i32, i32
  }
  func.func @transform_7(%arg0: i32) -> (i32, i32) {
    %c0_i32 = arith.constant 0 : i32
    %c0_i32_0 = arith.constant 0 : i32
    return %arg0, %c0_i32 : i32, i32
  }
}

module attributes {stable_mosaic.version = 11 : i64} {
  func.func @_srl_head_kernel(%arg0: i32, %arg1: memref<16x32xf32, #tpu.memory_space<vmem>>, %arg2: memref<32x32xf32, #tpu.memory_space<vmem>>, %arg3: memref<1x32xf32, #tpu.memory_space<vmem>>, %arg4: memref<32x32xf32, #tpu.memory_space<vmem>>, %arg5: memref<1x32xf32, #tpu.memory_space<vmem>>, %arg6: memref<32x128xf32, #tpu.memory_space<vmem>>, %arg7: memref<1x128xf32, #tpu.memory_space<vmem>>, %arg8: memref<16x128xf32, #tpu.memory_space<vmem>>) attributes {dimension_semantics = [#tpu.dimension_semantics<parallel>], iteration_bounds = array<i64: 1>, scalar_prefetch = 0 : i64, scratch_operands = 0 : i64, tpu.core_type = #tpu.core_type<tc>, window_params = [{transform_indices = @transform_0, window_bounds = array<i64: 16, 32>}, {pipeline_mode = #tpu.pipeline_mode<synchronous>, transform_indices = @transform_1, window_bounds = array<i64: 32, 32>}, {pipeline_mode = #tpu.pipeline_mode<synchronous>, transform_indices = @transform_2, window_bounds = array<i64: 1, 32>}, {pipeline_mode = #tpu.pipeline_mode<synchronous>, transform_indices = @transform_3, window_bounds = array<i64: 32, 32>}, {pipeline_mode = #tpu.pipeline_mode<synchronous>, transform_indices = @transform_4, window_bounds = array<i64: 1, 32>}, {pipeline_mode = #tpu.pipeline_mode<synchronous>, transform_indices = @transform_5, window_bounds = array<i64: 32, 128>}, {pipeline_mode = #tpu.pipeline_mode<synchronous>, transform_indices = @transform_6, window_bounds = array<i64: 1, 128>}, {transform_indices = @transform_7, window_bounds = array<i64: 16, 128>}]} {
    %c0 = arith.constant 0 : index
    %c0_0 = arith.constant 0 : index
    %0 = vector.load %arg1[%c0, %c0_0] : memref<16x32xf32, #tpu.memory_space<vmem>>, vector<16x32xf32>
    %c0_1 = arith.constant 0 : index
    %c0_2 = arith.constant 0 : index
    %1 = vector.load %arg2[%c0_1, %c0_2] : memref<32x32xf32, #tpu.memory_space<vmem>>, vector<32x32xf32>
    %cst = arith.constant dense<0.000000e+00> : vector<16x32xf32>
    %2 = tpu.matmul %0, %1, %cst {dimension_numbers = #tpu.dot_dimension_numbers<[1], [0], [0], [1], [0, 0, 1, 1], [], []>} : vector<16x32xf32>, vector<32x32xf32>, vector<16x32xf32> -> vector<16x32xf32>
    %c0_3 = arith.constant 0 : index
    %c0_4 = arith.constant 0 : index
    %3 = vector.load %arg3[%c0_3, %c0_4] : memref<1x32xf32, #tpu.memory_space<vmem>>, vector<1x32xf32>
    %4 = vector.broadcast %3 : vector<1x32xf32> to vector<16x32xf32>
    %5 = arith.addf %2, %4 : vector<16x32xf32>
    %6 = math.tanh %5 : vector<16x32xf32>
    %c0_5 = arith.constant 0 : index
    %c0_6 = arith.constant 0 : index
    %7 = vector.load %arg4[%c0_5, %c0_6] : memref<32x32xf32, #tpu.memory_space<vmem>>, vector<32x32xf32>
    %cst_7 = arith.constant dense<0.000000e+00> : vector<16x32xf32>
    %8 = tpu.matmul %6, %7, %cst_7 {dimension_numbers = #tpu.dot_dimension_numbers<[1], [0], [0], [1], [0, 0, 1, 1], [], []>} : vector<16x32xf32>, vector<32x32xf32>, vector<16x32xf32> -> vector<16x32xf32>
    %c0_8 = arith.constant 0 : index
    %c0_9 = arith.constant 0 : index
    %9 = vector.load %arg5[%c0_8, %c0_9] : memref<1x32xf32, #tpu.memory_space<vmem>>, vector<1x32xf32>
    %10 = vector.broadcast %9 : vector<1x32xf32> to vector<16x32xf32>
    %11 = arith.addf %8, %10 : vector<16x32xf32>
    %12 = math.tanh %11 : vector<16x32xf32>
    %c0_10 = arith.constant 0 : index
    %c0_11 = arith.constant 0 : index
    %13 = vector.load %arg6[%c0_10, %c0_11] : memref<32x128xf32, #tpu.memory_space<vmem>>, vector<32x128xf32>
    %cst_12 = arith.constant dense<0.000000e+00> : vector<16x128xf32>
    %14 = tpu.matmul %12, %13, %cst_12 {dimension_numbers = #tpu.dot_dimension_numbers<[1], [0], [0], [1], [0, 0, 1, 1], [], []>} : vector<16x32xf32>, vector<32x128xf32>, vector<16x128xf32> -> vector<16x128xf32>
    %c0_13 = arith.constant 0 : index
    %c0_14 = arith.constant 0 : index
    %15 = vector.load %arg7[%c0_13, %c0_14] : memref<1x128xf32, #tpu.memory_space<vmem>>, vector<1x128xf32>
    %16 = vector.broadcast %15 : vector<1x128xf32> to vector<16x128xf32>
    %17 = arith.addf %14, %16 : vector<16x128xf32>
    %c0_15 = arith.constant 0 : index
    %c0_16 = arith.constant 0 : index
    %18 = vector.load %arg8[%c0_15, %c0_16] : memref<16x128xf32, #tpu.memory_space<vmem>>, vector<16x128xf32>
    tpu.vector_store %arg8[%c0_15, %c0_16], %17 {strides = array<i32>} : memref<16x128xf32, #tpu.memory_space<vmem>>, vector<16x128xf32>,
    return
  }
  func.func @transform_0(%arg0: i32) -> (i32, i32) {
    %c0_i32 = arith.constant 0 : i32
    %c0_i32_0 = arith.constant 0 : i32
    return %arg0, %c0_i32 : i32, i32
  }
  func.func @transform_1(%arg0: i32) -> (i32, i32) {
    %c0_i32 = arith.constant 0 : i32
    %c0_i32_0 = arith.constant 0 : i32
    %c0_i32_1 = arith.constant 0 : i32
    return %c0_i32, %c0_i32_0 : i32, i32
  }
  func.func @transform_2(%arg0: i32) -> (i32, i32) {
    %c0_i32 = arith.constant 0 : i32
    %c0_i32_0 = arith.constant 0 : i32
    %c0_i32_1 = arith.constant 0 : i32
    return %c0_i32, %c0_i32_0 : i32, i32
  }
  func.func @transform_3(%arg0: i32) -> (i32, i32) {
    %c0_i32 = arith.constant 0 : i32
    %c0_i32_0 = arith.constant 0 : i32
    %c0_i32_1 = arith.constant 0 : i32
    return %c0_i32, %c0_i32_0 : i32, i32
  }
  func.func @transform_4(%arg0: i32) -> (i32, i32) {
    %c0_i32 = arith.constant 0 : i32
    %c0_i32_0 = arith.constant 0 : i32
    %c0_i32_1 = arith.constant 0 : i32
    return %c0_i32, %c0_i32_0 : i32, i32
  }
  func.func @transform_5(%arg0: i32) -> (i32, i32) {
    %c0_i32 = arith.constant 0 : i32
    %c0_i32_0 = arith.constant 0 : i32
    %c0_i32_1 = arith.constant 0 : i32
    return %c0_i32, %c0_i32_0 : i32, i32
  }
  func.func @transform_6(%arg0: i32) -> (i32, i32) {
    %c0_i32 = arith.constant 0 : i32
    %c0_i32_0 = arith.constant 0 : i32
    %c0_i32_1 = arith.constant 0 : i32
    return %c0_i32, %c0_i32_0 : i32, i32
  }
  func.func @transform_7(%arg0: i32) -> (i32, i32) {
    %c0_i32 = arith.constant 0 : i32
    %c0_i32_0 = arith.constant 0 : i32
    return %arg0, %c0_i32 : i32, i32
  }
}

</mosaic_0001>

<bundles_post_ra>
// kernel: tpu_custom_call.1
= control target key start
LH: loop header
LB: loop body
LE: loop exit
PB: predicated region body
PF: predicated region fallthrough
CT: control target
= control target key end

     0   :  { %12 = vsyncpa [#allocation3], 0  ;;  %s479_s0 = inlined_call_operand.hbm [shape: f32[16,32], index: 0, kind: input, shape index: {}]   ;;  %s480_s1 = inlined_call_operand.hbm [shape: f32[32,32], index: 1, kind: input, shape index: {}]   ;;  %s481_s2 = inlined_call_operand.vmem [shape: f32[1,32], index: 2, kind: input, shape index: {}]   ;;  %s482_s3 = inlined_call_operand.hbm [shape: f32[32,32], index: 3, kind: input, shape index: {}]   ;;  %s483_s4 = inlined_call_operand.vmem [shape: f32[1,32], index: 4, kind: input, shape index: {}]   ;;  %s484_s5 = inlined_call_operand.hbm [shape: f32[32,128], index: 5, kind: input, shape index: {}]   ;;  %s485_s6 = inlined_call_operand.vmem [shape: f32[1,128], index: 6, kind: input, shape index: {}]   ;;  %s486_s7 = inlined_call_operand.hbm [shape: f32[16,128], index: 7, kind: output, shape index: {}]  }
   0x1   :  { %13 = vsyncpa [#allocation6], 0 }
   0x2   :  { %14 = vsyncpa [#allocation9], 0 }
   0x3   :  { %15 = vsyncpa [#allocation4], 0  ;;  %s33_s26 = sshll.u32 %s480_s1, 4  ;;  %s387_s27 = smov [#allocation5]   ;;  %s34_s26 = int_to_ptr.hbm [resolvable:$true] %s33_s26 }
   0x4   :  { %s35_s28 = sshll.u32 %s387_s27, 4  ;;  %s20_s8 = sshll.u32 %s479_s0, 4  ;;  %s36_s28 = int_to_ptr.vmem [resolvable:$true] %s35_s28  ;;  %s21_s8 = int_to_ptr.hbm [resolvable:$true] %s20_s8 }
   0x5   :  { %s388_s9 = smov 128   ;;  %s389_s10 = smov 8  }
   0x6   :  { %41 = dma.hbm_to_vmem [thread:$0]  %s34_s26, 512, %s36_s28, [#allocation6], %s388_s9, %s388_s9, %s389_s10  }
   0x7   :  { %s390_s11 = smov [#allocation2]   ;;  %s48_s1 = sshll.u32 %s482_s3, 4  ;;  %s49_s1 = int_to_ptr.hbm [resolvable:$true] %s48_s1 }
   0x8   :  { %s22_s12 = sshll.u32 %s390_s11, 4  ;;  %s63_s16 = sshll.u32 %s484_s5, 4  ;;  %s23_s12 = int_to_ptr.vmem [resolvable:$true] %s22_s12  ;;  %s64_s16 = int_to_ptr.hbm [resolvable:$true] %s63_s16 }
   0x9   :  { %28 = dma.hbm_to_vmem [thread:$0]  %s21_s8, 256, %s23_s12, [#allocation3], %s388_s9, %s388_s9, %s389_s10  }
   0xa   :  { %s391_s17 = smov [#allocation7]   ;;  %s392_s19 = smov [#allocation8]  }
   0xb   :  { %s50_s18 = sshll.u32 %s391_s17, 4  ;;  %s65_s3 = sshll.u32 %s392_s19, 4  ;;  %s51_s18 = int_to_ptr.vmem [resolvable:$true] %s50_s18  ;;  %s66_s3 = int_to_ptr.vmem [resolvable:$true] %s65_s3 }
   0xc   :  { %56 = dma.hbm_to_vmem [thread:$0]  %s49_s1, 512, %s51_s18, [#allocation6], %s388_s9, %s388_s9, %s389_s10  }
   0xd   :  { %71 = dma.hbm_to_vmem [thread:$0]  %s64_s16, 512, %s66_s3, [#allocation9], %s388_s9, %s388_s9, %s389_s10  }
   0xe   :  { %379 = dma.done.wait [#allocation3], 256  }
   0xf   :  { %380 = vsyncadd [#allocation3], 4294967040 }
  0x10   :  { %381 = dma.done.wait [#allocation6], 1024  }
  0x11   :  { %382 = vsyncadd [#allocation6], 4294966272 }
  0x12   :  { %383 = dma.done.wait [#allocation9], 512  }
  0x13   :  { %384 = vsyncadd [#allocation9], 4294966784  ;;  %v95_v0 = vld [vmem:[#allocation5 + $0x18] sm:$0xff]  ;;  %v94_v1 = vld [vmem:[#allocation5 + $0x10] sm:$0xff]  ;;  %vm100_vm0 = vcmask 261120   ;;  %s216_s27 = sshll.u32 %s486_s7, 4  ;;  %s217_s27 = int_to_ptr.hbm [resolvable:$true] %s216_s27 }
  0x14   :  { %119 = vmatpush.msra.mxu0 %v95_v0  ;;  %237 = vmatpush.msra.mxu3 %v95_v0  ;;  %v93_v2 = vld [vmem:[#allocation5 + $0x8] sm:$0xff]  ;;  %v92_v3 = vld [vmem:[#allocation5] sm:$0xff]  ;;  %v90_v4 = vld [vmem:[#allocation2] sm:$0xff] }
  0x15   :  { %v91_v5 = vld [vmem:[#allocation2 + $0x8] sm:$0xff]  ;;  %v134_v7 = vld [vmem:[#allocation7 + $0x10] sm:$0xff]  ;;  %v133_v8 = vld [vmem:[#allocation7 + $0x8] sm:$0xff] }
  0x16   :  { %120 = vmatpush.msra.mxu0 %v94_v1  ;;  %238 = vmatpush.msra.mxu3 %v94_v1  ;;  %v135_v6 = vld [vmem:[#allocation7 + $0x18] sm:$0xff]  ;;  %v132_v9 = vld [vmem:[#allocation7] sm:$0xff]  ;;  %v248_v10 = vld [vmem:[%s481_s2] ss:$0 sm:$0xff] }
  0x17   :  { %158 = vmatpush.msra.mxu1 %v135_v6  ;;  %v174_v17 = vld [vmem:[#allocation8 + $0x18] sm:$0xff]  ;;  %v173_v18 = vld [vmem:[#allocation8 + $0x10] sm:$0xff]  ;;  %v172_v19 = vld [vmem:[#allocation8 + $0x8] sm:$0xff] }
  0x18   :  { %121 = vmatpush.msra.mxu0 %v93_v2  ;;  %239 = vmatpush.msra.mxu3 %v93_v2  ;;  %v171_v20 = vld [vmem:[#allocation8] sm:$0xff]  ;;  %v249_v21 = vld [vmem:[%s483_s4] ss:$0 sm:$0xff]  ;;  %s393_s4 = smov [#allocation10]  }
  0x19   :  { %159 = vmatpush.msra.mxu1 %v134_v7  ;;  %197 = vmatpush.msra.mxu2 %v174_v17  ;;  %v250_v28 = vld [vmem:[%s485_s6] ss:$0 sm:$0xff]  ;;  %s214_s24 = sshll.u32 %s393_s4, 4  ;;  %s215_s24 = int_to_ptr.vmem [resolvable:$true] %s214_s24 }
  0x1a   :  { %122 = vmatpush.msra.mxu0 %v92_v3  ;;  %240 = vmatpush.msra.mxu3 %v92_v3 }
  0x1b   :  { %231 = vmatmul.msk.f32.vlgmr.msra.gmra.mxu0 %vm100_vm0, %v90_v4  ;;  %232 = vmatmul.msk.f32.vlgmr.msra.gmra.mxu3 %vm100_vm0, %v91_v5 }
  0x1c   :  { %160 = vmatpush.msra.mxu1 %v133_v8  ;;  %198 = vmatpush.msra.mxu2 %v173_v18 }
  0x1e   :  { %161 = vmatpush.msra.mxu1 %v132_v9  ;;  %199 = vmatpush.msra.mxu2 %v172_v19 }
  0x20   :  { %200 = vmatpush.msra.mxu2 %v171_v20 }
  0x98   :  { %v124_v11 = vpop.f32.mrf.mxu0 }
  0x99   :  { %v125_v12 = vadd.f32 %v248_v10, %v124_v11 }
  0x9b   :  { %251 = vtanh.f32 %v125_v12 }
  0x9e   :  { %v127_v13 = vpop.f32.mrf.mxu3 }
  0x9f   :  { %v128_v14 = vadd.f32 %v248_v10, %v127_v13 }
  0xa1   :  { %v252_v15 = vpop.eup %251  ;;  %253 = vtanh.f32 %v128_v14 }
  0xa2   :  { %233 = vmatmul.msk.f32.vlgmr.msra.gmra.mxu1 %vm100_vm0, %v252_v15 }
  0xa7   :  { %v254_v16 = vpop.eup %253 }
  0xaa   :  { %234 = vmatmul.msk.f32.gmra.mxu1 %vm100_vm0, %v254_v16 }
 0x11f   :  { %v163_v22 = vpop.f32.mrf.mxu1 }
 0x120   :  { %v164_v23 = vadd.f32 %v249_v21, %v163_v22 }
 0x122   :  { %255 = vtanh.f32 %v164_v23 }
 0x127   :  { %v166_v24 = vpop.f32.mrf.mxu1 }
 0x128   :  { %v256_v25 = vpop.eup %255  ;;  %v167_v26 = vadd.f32 %v249_v21, %v166_v24 }
 0x129   :  { %235 = vmatmul.msk.f32.vlgmr.msra.gmra.mxu2 %vm100_vm0, %v256_v25 }
 0x12a   :  { %257 = vtanh.f32 %v167_v26 }
 0x130   :  { %v258_v27 = vpop.eup %257 }
 0x131   :  { %236 = vmatmul.msk.f32.gmra.mxu2 %vm100_vm0, %v258_v27 }
 0x1ac   :  { %v202_v29 = vpop.f32.mrf.mxu2 }
 0x1ad   :  { %v203_v30 = vadd.f32 %v250_v28, %v202_v29 }
 0x1af   :  { %208 = vst [vmem:[#allocation10] sm:$0xff] %v203_v30 }
 0x1b4   :  { %v205_v31 = vpop.f32.mrf.mxu2 }
 0x1b5   :  { %v206_v32 = vadd.f32 %v250_v28, %v205_v31 }
 0x1b7   :  { %209 = vst [vmem:[#allocation10 + $0x8] sm:$0xff] %v206_v32 }
 0x1b8   :  { %222 = dma.vmem_to_hbm [thread:$0]  %s215_s24, 256, %s217_s27, [#allocation4], %s388_s9, %s388_s9, %s389_s10  }
 0x1b9   :  { %385 = dma.done.wait [#allocation4], 256  }
 0x1ba   :  { %386 = vsyncadd [#allocation4], 4294967040 }
 0x1bb   :  { %227 = vsyncpa [#allocation3], 1 }
 0x1bc   :  { %228 = vsyncpa [#allocation6], 1 }
 0x1bd   :  { %229 = vsyncpa [#allocation9], 1 }
 0x1be   :  { %230 = vsyncpa [#allocation4], 1 }

// kernel: tpu_custom_call.1
= control target key start
LH: loop header
LB: loop body
LE: loop exit
PB: predicated region body
PF: predicated region fallthrough
CT: control target
= control target key end

     0   :  { %12 = vsyncpa [#allocation3], 0  ;;  %s479_s0 = inlined_call_operand.hbm [shape: f32[16,32], index: 0, kind: input, shape index: {}]   ;;  %s480_s1 = inlined_call_operand.hbm [shape: f32[32,32], index: 1, kind: input, shape index: {}]   ;;  %s481_s2 = inlined_call_operand.vmem [shape: f32[1,32], index: 2, kind: input, shape index: {}]   ;;  %s482_s3 = inlined_call_operand.hbm [shape: f32[32,32], index: 3, kind: input, shape index: {}]   ;;  %s483_s4 = inlined_call_operand.vmem [shape: f32[1,32], index: 4, kind: input, shape index: {}]   ;;  %s484_s5 = inlined_call_operand.hbm [shape: f32[32,128], index: 5, kind: input, shape index: {}]   ;;  %s485_s6 = inlined_call_operand.vmem [shape: f32[1,128], index: 6, kind: input, shape index: {}]   ;;  %s486_s7 = inlined_call_operand.hbm [shape: f32[16,128], index: 7, kind: output, shape index: {}]  }
   0x1   :  { %13 = vsyncpa [#allocation6], 0 }
   0x2   :  { %14 = vsyncpa [#allocation9], 0 }
   0x3   :  { %15 = vsyncpa [#allocation4], 0  ;;  %s33_s26 = sshll.u32 %s480_s1, 4  ;;  %s387_s27 = smov [#allocation5]   ;;  %s34_s26 = int_to_ptr.hbm [resolvable:$true] %s33_s26 }
   0x4   :  { %s35_s28 = sshll.u32 %s387_s27, 4  ;;  %s20_s8 = sshll.u32 %s479_s0, 4  ;;  %s36_s28 = int_to_ptr.vmem [resolvable:$true] %s35_s28  ;;  %s21_s8 = int_to_ptr.hbm [resolvable:$true] %s20_s8 }
   0x5   :  { %s388_s9 = smov 128   ;;  %s389_s10 = smov 8  }
   0x6   :  { %41 = dma.hbm_to_vmem [thread:$0]  %s34_s26, 512, %s36_s28, [#allocation6], %s388_s9, %s388_s9, %s389_s10  }
   0x7   :  { %s390_s11 = smov [#allocation2]   ;;  %s48_s1 = sshll.u32 %s482_s3, 4  ;;  %s49_s1 = int_to_ptr.hbm [resolvable:$true] %s48_s1 }
   0x8   :  { %s22_s12 = sshll.u32 %s390_s11, 4  ;;  %s63_s16 = sshll.u32 %s484_s5, 4  ;;  %s23_s12 = int_to_ptr.vmem [resolvable:$true] %s22_s12  ;;  %s64_s16 = int_to_ptr.hbm [resolvable:$true] %s63_s16 }
   0x9   :  { %28 = dma.hbm_to_vmem [thread:$0]  %s21_s8, 256, %s23_s12, [#allocation3], %s388_s9, %s388_s9, %s389_s10  }
   0xa   :  { %s391_s17 = smov [#allocation7]   ;;  %s392_s19 = smov [#allocation8]  }
   0xb   :  { %s50_s18 = sshll.u32 %s391_s17, 4  ;;  %s65_s3 = sshll.u32 %s392_s19, 4  ;;  %s51_s18 = int_to_ptr.vmem [resolvable:$true] %s50_s18  ;;  %s66_s3 = int_to_ptr.vmem [resolvable:$true] %s65_s3 }
   0xc   :  { %56 = dma.hbm_to_vmem [thread:$0]  %s49_s1, 512, %s51_s18, [#allocation6], %s388_s9, %s388_s9, %s389_s10  }
   0xd   :  { %71 = dma.hbm_to_vmem [thread:$0]  %s64_s16, 512, %s66_s3, [#allocation9], %s388_s9, %s388_s9, %s389_s10  }
   0xe   :  { %379 = dma.done.wait [#allocation3], 256  }
   0xf   :  { %380 = vsyncadd [#allocation3], 4294967040 }
  0x10   :  { %381 = dma.done.wait [#allocation6], 1024  }
  0x11   :  { %382 = vsyncadd [#allocation6], 4294966272 }
  0x12   :  { %383 = dma.done.wait [#allocation9], 512  }
  0x13   :  { %384 = vsyncadd [#allocation9], 4294966784  ;;  %v95_v0 = vld [vmem:[#allocation5 + $0x18] sm:$0xff]  ;;  %v94_v1 = vld [vmem:[#allocation5 + $0x10] sm:$0xff]  ;;  %vm100_vm0 = vcmask 261120   ;;  %s216_s27 = sshll.u32 %s486_s7, 4  ;;  %s217_s27 = int_to_ptr.hbm [resolvable:$true] %s216_s27 }
  0x14   :  { %119 = vmatpush.msra.mxu0 %v95_v0  ;;  %237 = vmatpush.msra.mxu3 %v95_v0  ;;  %v93_v2 = vld [vmem:[#allocation5 + $0x8] sm:$0xff]  ;;  %v92_v3 = vld [vmem:[#allocation5] sm:$0xff]  ;;  %v90_v4 = vld [vmem:[#allocation2] sm:$0xff] }
  0x15   :  { %v91_v5 = vld [vmem:[#allocation2 + $0x8] sm:$0xff]  ;;  %v134_v7 = vld [vmem:[#allocation7 + $0x10] sm:$0xff]  ;;  %v133_v8 = vld [vmem:[#allocation7 + $0x8] sm:$0xff] }
  0x16   :  { %120 = vmatpush.msra.mxu0 %v94_v1  ;;  %238 = vmatpush.msra.mxu3 %v94_v1  ;;  %v135_v6 = vld [vmem:[#allocation7 + $0x18] sm:$0xff]  ;;  %v132_v9 = vld [vmem:[#allocation7] sm:$0xff]  ;;  %v248_v10 = vld [vmem:[%s481_s2] ss:$0 sm:$0xff] }
  0x17   :  { %158 = vmatpush.msra.mxu1 %v135_v6  ;;  %v174_v17 = vld [vmem:[#allocation8 + $0x18] sm:$0xff]  ;;  %v173_v18 = vld [vmem:[#allocation8 + $0x10] sm:$0xff]  ;;  %v172_v19 = vld [vmem:[#allocation8 + $0x8] sm:$0xff] }
  0x18   :  { %121 = vmatpush.msra.mxu0 %v93_v2  ;;  %239 = vmatpush.msra.mxu3 %v93_v2  ;;  %v171_v20 = vld [vmem:[#allocation8] sm:$0xff]  ;;  %v249_v21 = vld [vmem:[%s483_s4] ss:$0 sm:$0xff]  ;;  %s393_s4 = smov [#allocation10]  }
  0x19   :  { %159 = vmatpush.msra.mxu1 %v134_v7  ;;  %197 = vmatpush.msra.mxu2 %v174_v17  ;;  %v250_v28 = vld [vmem:[%s485_s6] ss:$0 sm:$0xff]  ;;  %s214_s24 = sshll.u32 %s393_s4, 4  ;;  %s215_s24 = int_to_ptr.vmem [resolvable:$true] %s214_s24 }
  0x1a   :  { %122 = vmatpush.msra.mxu0 %v92_v3  ;;  %240 = vmatpush.msra.mxu3 %v92_v3 }
  0x1b   :  { %231 = vmatmul.msk.f32.vlgmr.msra.gmra.mxu0 %vm100_vm0, %v90_v4  ;;  %232 = vmatmul.msk.f32.vlgmr.msra.gmra.mxu3 %vm100_vm0, %v91_v5 }
  0x1c   :  { %160 = vmatpush.msra.mxu1 %v133_v8  ;;  %198 = vmatpush.msra.mxu2 %v173_v18 }
  0x1e   :  { %161 = vmatpush.msra.mxu1 %v132_v9  ;;  %199 = vmatpush.msra.mxu2 %v172_v19 }
  0x20   :  { %200 = vmatpush.msra.mxu2 %v171_v20 }
  0x98   :  { %v124_v11 = vpop.f32.mrf.mxu0 }
  0x99   :  { %v125_v12 = vadd.f32 %v248_v10, %v124_v11 }
  0x9b   :  { %251 = vtanh.f32 %v125_v12 }
  0x9e   :  { %v127_v13 = vpop.f32.mrf.mxu3 }
  0x9f   :  { %v128_v14 = vadd.f32 %v248_v10, %v127_v13 }
  0xa1   :  { %v252_v15 = vpop.eup %251  ;;  %253 = vtanh.f32 %v128_v14 }
  0xa2   :  { %233 = vmatmul.msk.f32.vlgmr.msra.gmra.mxu1 %vm100_vm0, %v252_v15 }
  0xa7   :  { %v254_v16 = vpop.eup %253 }
  0xaa   :  { %234 = vmatmul.msk.f32.gmra.mxu1 %vm100_vm0, %v254_v16 }
 0x11f   :  { %v163_v22 = vpop.f32.mrf.mxu1 }
 0x120   :  { %v164_v23 = vadd.f32 %v249_v21, %v163_v22 }
 0x122   :  { %255 = vtanh.f32 %v164_v23 }
 0x127   :  { %v166_v24 = vpop.f32.mrf.mxu1 }
 0x128   :  { %v256_v25 = vpop.eup %255  ;;  %v167_v26 = vadd.f32 %v249_v21, %v166_v24 }
 0x129   :  { %235 = vmatmul.msk.f32.vlgmr.msra.gmra.mxu2 %vm100_vm0, %v256_v25 }
 0x12a   :  { %257 = vtanh.f32 %v167_v26 }
 0x130   :  { %v258_v27 = vpop.eup %257 }
 0x131   :  { %236 = vmatmul.msk.f32.gmra.mxu2 %vm100_vm0, %v258_v27 }
 0x1ac   :  { %v202_v29 = vpop.f32.mrf.mxu2 }
 0x1ad   :  { %v203_v30 = vadd.f32 %v250_v28, %v202_v29 }
 0x1af   :  { %208 = vst [vmem:[#allocation10] sm:$0xff] %v203_v30 }
 0x1b4   :  { %v205_v31 = vpop.f32.mrf.mxu2 }
 0x1b5   :  { %v206_v32 = vadd.f32 %v250_v28, %v205_v31 }
 0x1b7   :  { %209 = vst [vmem:[#allocation10 + $0x8] sm:$0xff] %v206_v32 }
 0x1b8   :  { %222 = dma.vmem_to_hbm [thread:$0]  %s215_s24, 256, %s217_s27, [#allocation4], %s388_s9, %s388_s9, %s389_s10  }
 0x1b9   :  { %385 = dma.done.wait [#allocation4], 256  }
 0x1ba   :  { %386 = vsyncadd [#allocation4], 4294967040 }
 0x1bb   :  { %227 = vsyncpa [#allocation3], 1 }
 0x1bc   :  { %228 = vsyncpa [#allocation6], 1 }
 0x1bd   :  { %229 = vsyncpa [#allocation9], 1 }
 0x1be   :  { %230 = vsyncpa [#allocation4], 1 }

</bundles_post_ra>
